<compile_context>
chip_gen: v5e
topology: v5e:2x2
jax: 0.10.0
libtpu: 0.0.40
codegen_flags: <defaults>
</compile_context>

<pallas_src>
import jax
import jax.numpy as jnp
from jax.experimental import pallas as pl
from jax.experimental.pallas import tpu as pltpu

EPS = 1e-5


def _bn_relu(h, gb):
    """BatchNorm1d (training-mode batch stats, biased var) + ReLU.

    gb: (2, H) slab -- row 0 = gamma, row 1 = beta.

    mean and E[h^2] come from a single XLU reduction over the lane-concat
    [h | h*h] slab when 2H <= 128 (one vreg row); var = E[h^2] - mean^2
    (clamped >= 0), then one fused per-feature scale/shift + ReLU.
    """
    B, H = h.shape
    inv_b = 1.0 / B                                      # static
    if 2 * H <= 128:
        slab = jnp.concatenate([h, h * h], axis=-1)      # (B, 2H), one vreg row
        sums = jnp.sum(slab, axis=0, keepdims=True) * inv_b
        mean, mean_sq = sums[:, :H], sums[:, H:]
    else:
        mean = jnp.sum(h, axis=0, keepdims=True) * inv_b
        mean_sq = jnp.sum(h * h, axis=0, keepdims=True) * inv_b
    var = jnp.maximum(mean_sq - mean * mean, 0.0)        # biased variance
    scale = gb[0:1, :] * jax.lax.rsqrt(var + EPS)        # gamma * rsqrt(var+eps)
    shift = gb[1:2, :] - mean * scale                    # beta - mean*scale
    return jnp.maximum(h * scale + shift, 0.0)


def dis_kernel(x_ref, w_in_ref, w_mid_ref, gb_ref, w_out_ref, b_out_ref, out_ref):
    # ---- input layer: Linear (bf16 MXU, f32 acc; pre-BN bias dropped) -> BN -> ReLU
    h = jnp.dot(x_ref[...].astype(jnp.bfloat16), w_in_ref[...],
                preferred_element_type=jnp.float32)
    h = _bn_relu(h, gb_ref[0])

    # ---- mid layers: (num_hidden_layer - 1) x [Linear -> BN -> ReLU]
    n_mid = w_mid_ref.shape[0]  # static
    for l in range(n_mid):
        h = jnp.dot(h.astype(jnp.bfloat16), w_mid_ref[l],
                    preferred_element_type=jnp.float32)
        h = _bn_relu(h, gb_ref[l + 1])

    # ---- output layer: Linear(hidden, 1) -> Sigmoid
    # N=1 matmul done as VPU multiply + lane reduction (w_out is (1, hidden)).
    logits = jnp.sum(h * w_out_ref[...], axis=-1, keepdims=True) + b_out_ref[0]
    # sigmoid = 1 / (1 + exp(-x)): exp + approximate reciprocal both on the EUP.
    out_ref[...] = pl.reciprocal(1.0 + jnp.exp(-logits), approx=True)


def dis_forward(x, params):
    """Run the Dis forward pass as a single Pallas kernel.

    x: (B, input_size) float32
    returns: (B, 1) float32 in (0, 1)
    """
    w_in, w_mid, gb, w_out, b_out = params
    B = x.shape[0]

    vmem = pl.BlockSpec(memory_space=pltpu.MemorySpace.VMEM)
    smem = pl.BlockSpec(memory_space=pltpu.MemorySpace.SMEM)

    return pl.pallas_call(
        dis_kernel,
        out_shape=jax.ShapeDtypeStruct((B, 1), jnp.float32),
        in_specs=[vmem, vmem, vmem, vmem, vmem, smem],
        out_specs=vmem,
        compiler_params=pltpu.CompilerParams(
            # Well under v7x's 64 MiB physical VMEM (smallest of v5e/v6e/v7x);
            # at today's shapes the kernel only uses a few KiB anyway.
            vmem_limit_bytes=32 * 1024 * 1024,
        ),
    )(x, w_in, w_mid, gb, w_out, b_out)


def init_params(key, input_size, num_hidden_layer, hidden_size):
    """Deterministic synthetic parameters.

    Linear weights are stored pre-transposed to (in_features, out_features)
    and cast to bfloat16 (MXU input dtype).  The pre-BN Linear biases are
    omitted (they cancel exactly under training-mode BatchNorm).  All BN
    gamma/beta are packed into one (num_hidden_layer, 2, H) float32 array.
    The output-layer weight is a (1, hidden) float32 row (VPU path), its bias
    a (1,) float32 scalar routed through SMEM.
    """
    n_mid = num_hidden_layer - 1
    keys = jax.random.split(key, 2 + n_mid)
    k_iter = iter(keys)

    def lin_w(k, fan_in, fan_out):
        bound = 1.0 / jnp.sqrt(jnp.float32(fan_in))
        return jax.random.uniform(k, (fan_in, fan_out), jnp.float32, -bound, bound)

    # input layer weight
    w_in = lin_w(next(k_iter), input_size, hidden_size).astype(jnp.bfloat16)

    # mid layer weights (stacked along a leading layer axis)
    w_mid = jnp.stack(
        [lin_w(next(k_iter), hidden_size, hidden_size) for _ in range(n_mid)],
        axis=0).astype(jnp.bfloat16)                                  # (n_mid, H, H)

    # packed BN affine params: [l, 0] = gamma, [l, 1] = beta (PyTorch defaults)
    gb = jnp.stack(
        [jnp.ones((num_hidden_layer, hidden_size), jnp.float32),
         jnp.zeros((num_hidden_layer, hidden_size), jnp.float32)],
        axis=1)                                                       # (L, 2, H)

    # output layer: (1, hidden) weight row + (1,) bias scalar
    kw, kb = jax.random.split(next(k_iter))
    bound = 1.0 / jnp.sqrt(jnp.float32(hidden_size))
    w_out = jax.random.uniform(kw, (1, hidden_size), jnp.float32, -bound, bound)
    b_out = jax.random.uniform(kb, (1,), jnp.float32, -bound, bound)

    return (w_in, w_mid, gb, w_out, b_out)


def dis_forward_ref(x, params):
    """Pure-JAX reference (two-pass BN stats, same bf16 weights / f32 acc)."""
    w_in, w_mid, gb, w_out, b_out = params

    def bn_relu(h, g, be):
        m = jnp.mean(h, axis=0, keepdims=True)
        v = jnp.mean((h - m) ** 2, axis=0, keepdims=True)
        return jnp.maximum(((h - m) / jnp.sqrt(v + EPS)) * g + be, 0.0)

    h = jnp.dot(x.astype(jnp.bfloat16), w_in, preferred_element_type=jnp.float32)
    h = bn_relu(h, gb[0, 0:1], gb[0, 1:2])
    for l in range(w_mid.shape[0]):
        h = jnp.dot(h.astype(jnp.bfloat16), w_mid[l],
                    preferred_element_type=jnp.float32)
        h = bn_relu(h, gb[l + 1, 0:1], gb[l + 1, 1:2])
    logits = jnp.sum(h * w_out, axis=-1, keepdims=True) + b_out[0]
    return jax.nn.sigmoid(logits)


if __name__ == "__main__":
    # Small shapes consistent with the module: batch=8, input_size=16,
    # hidden_size=32, num_hidden_layer=3 (-> 2 mid layers).
    B, INPUT_SIZE, HIDDEN, NUM_HIDDEN_LAYER = 8, 16, 32, 3

    key = jax.random.PRNGKey(0)
    k_x, k_p = jax.random.split(key)
    x = jax.random.normal(k_x, (B, INPUT_SIZE), jnp.float32)
    params = init_params(k_p, INPUT_SIZE, NUM_HIDDEN_LAYER, HIDDEN)

    out = jax.block_until_ready(dis_forward(x, params))
    ref = dis_forward_ref(x, params)

    assert out.shape == (B, 1)
    assert bool(jnp.all((out > 0.0) & (out < 1.0)))
    # Kernel uses one-pass variance (E[h^2]-mean^2) and an approximate EUP
    # reciprocal in the sigmoid (~2^-12 rel err); reference uses two-pass var
    # and exact sigmoid.  Tolerance covers both.
    assert jnp.allclose(out, ref, atol=1e-3, rtol=1e-3)

    print("KERNEL_OK")
</pallas_src>

<mosaic_0001>
module attributes {stable_mosaic.version = 11 : i64} {
  func.func @dis_kernel(%arg0: memref<8x16xf32, #tpu.memory_space<vmem>>, %arg1: memref<16x32xbf16, #tpu.memory_space<vmem>>, %arg2: memref<2x32x32xbf16, #tpu.memory_space<vmem>>, %arg3: memref<3x2x32xf32, #tpu.memory_space<vmem>>, %arg4: memref<1x32xf32, #tpu.memory_space<vmem>>, %arg5: memref<1xf32, #tpu.memory_space<smem>>, %arg6: memref<8x1xf32, #tpu.memory_space<vmem>>) attributes {dimension_semantics = [], scalar_prefetch = 0 : i64, scratch_operands = 0 : i64, tpu.core_type = #tpu.core_type<tc>} {
    %c0 = arith.constant 0 : index
    %c0_0 = arith.constant 0 : index
    %0 = vector.load %arg0[%c0, %c0_0] : memref<8x16xf32, #tpu.memory_space<vmem>>, vector<8x16xf32>
    %1 = arith.truncf %0 : vector<8x16xf32> to vector<8x16xbf16>
    %c0_1 = arith.constant 0 : index
    %c0_2 = arith.constant 0 : index
    %2 = vector.load %arg1[%c0_1, %c0_2] : memref<16x32xbf16, #tpu.memory_space<vmem>>, vector<16x32xbf16>
    %cst = arith.constant dense<0.000000e+00> : vector<8x32xf32>
    %3 = tpu.matmul %1, %2, %cst {dimension_numbers = #tpu.dot_dimension_numbers<[1], [0], [0], [1], [0, 0, 1, 1], [], []>} : vector<8x16xbf16>, vector<16x32xbf16>, vector<8x32xf32> -> vector<8x32xf32>
    %c0_3 = arith.constant 0 : index
    %c0_4 = arith.constant 0 : index
    %c0_5 = arith.constant 0 : index
    %4 = vector.load %arg3[%c0_3, %c0_4, %c0_5] : memref<3x2x32xf32, #tpu.memory_space<vmem>>, vector<1x2x32xf32>
    %5 = vector.shape_cast %4 : vector<1x2x32xf32> to vector<2x32xf32>
    %6 = arith.mulf %3, %3 : vector<8x32xf32>
    %7 = tpu.concatenate %3, %6 in 1 : vector<8x32xf32>, vector<8x32xf32> -> vector<8x64xf32>
    %cst_6 = arith.constant dense<0.000000e+00> : vector<64xf32>
    %8 = vector.multi_reduction <add>, %7, %cst_6 [0] : vector<8x64xf32> to vector<64xf32>
    %9 = vector.shape_cast %8 : vector<64xf32> to vector<1x64xf32>
    %cst_7 = arith.constant 1.250000e-01 : f32
    %10 = vector.broadcast %cst_7 : f32 to vector<1x64xf32>
    %11 = arith.mulf %9, %10 : vector<1x64xf32>
    %12 = vector.extract_strided_slice %11 {offsets = [0, 0], sizes = [1, 32], strides = [1, 1]} : vector<1x64xf32> to vector<1x32xf32>
    %13 = vector.extract_strided_slice %11 {offsets = [0, 32], sizes = [1, 32], strides = [1, 1]} : vector<1x64xf32> to vector<1x32xf32>
    %14 = arith.mulf %12, %12 : vector<1x32xf32>
    %15 = arith.subf %13, %14 : vector<1x32xf32>
    %cst_8 = arith.constant 0.000000e+00 : f32
    %16 = vector.broadcast %cst_8 : f32 to vector<1x32xf32>
    %17 = arith.maximumf %15, %16 : vector<1x32xf32>
    %18 = vector.extract_strided_slice %5 {offsets = [0, 0], sizes = [1, 32], strides = [1, 1]} : vector<2x32xf32> to vector<1x32xf32>
    %cst_9 = arith.constant 9.99999974E-6 : f32
    %19 = vector.broadcast %cst_9 : f32 to vector<1x32xf32>
    %20 = arith.addf %17, %19 : vector<1x32xf32>
    %21 = math.rsqrt %20 : vector<1x32xf32>
    %22 = arith.mulf %18, %21 : vector<1x32xf32>
    %23 = vector.extract_strided_slice %5 {offsets = [1, 0], sizes = [1, 32], strides = [1, 1]} : vector<2x32xf32> to vector<1x32xf32>
    %24 = arith.mulf %12, %22 : vector<1x32xf32>
    %25 = arith.subf %23, %24 : vector<1x32xf32>
    %26 = vector.broadcast %22 : vector<1x32xf32> to vector<8x32xf32>
    %27 = arith.mulf %3, %26 : vector<8x32xf32>
    %28 = vector.broadcast %25 : vector<1x32xf32> to vector<8x32xf32>
    %29 = arith.addf %27, %28 : vector<8x32xf32>
    %cst_10 = arith.constant 0.000000e+00 : f32
    %30 = vector.broadcast %cst_10 : f32 to vector<8x32xf32>
    %31 = arith.maximumf %29, %30 : vector<8x32xf32>
    %32 = arith.truncf %31 : vector<8x32xf32> to vector<8x32xbf16>
    %c0_11 = arith.constant 0 : index
    %c0_12 = arith.constant 0 : index
    %c0_13 = arith.constant 0 : index
    %33 = vector.load %arg2[%c0_11, %c0_12, %c0_13] : memref<2x32x32xbf16, #tpu.memory_space<vmem>>, vector<1x32x32xbf16>
    %34 = vector.shape_cast %33 : vector<1x32x32xbf16> to vector<32x32xbf16>
    %cst_14 = arith.constant dense<0.000000e+00> : vector<8x32xf32>
    %35 = tpu.matmul %32, %34, %cst_14 {dimension_numbers = #tpu.dot_dimension_numbers<[1], [0], [0], [1], [0, 0, 1, 1], [], []>} : vector<8x32xbf16>, vector<32x32xbf16>, vector<8x32xf32> -> vector<8x32xf32>
    %c1 = arith.constant 1 : index
    %c0_15 = arith.constant 0 : index
    %c0_16 = arith.constant 0 : index
    %36 = vector.load %arg3[%c1, %c0_15, %c0_16] : memref<3x2x32xf32, #tpu.memory_space<vmem>>, vector<1x2x32xf32>
    %37 = vector.shape_cast %36 : vector<1x2x32xf32> to vector<2x32xf32>
    %38 = arith.mulf %35, %35 : vector<8x32xf32>
    %39 = tpu.concatenate %35, %38 in 1 : vector<8x32xf32>, vector<8x32xf32> -> vector<8x64xf32>
    %cst_17 = arith.constant dense<0.000000e+00> : vector<64xf32>
    %40 = vector.multi_reduction <add>, %39, %cst_17 [0] : vector<8x64xf32> to vector<64xf32>
    %41 = vector.shape_cast %40 : vector<64xf32> to vector<1x64xf32>
    %cst_18 = arith.constant 1.250000e-01 : f32
    %42 = vector.broadcast %cst_18 : f32 to vector<1x64xf32>
    %43 = arith.mulf %41, %42 : vector<1x64xf32>
    %44 = vector.extract_strided_slice %43 {offsets = [0, 0], sizes = [1, 32], strides = [1, 1]} : vector<1x64xf32> to vector<1x32xf32>
    %45 = vector.extract_strided_slice %43 {offsets = [0, 32], sizes = [1, 32], strides = [1, 1]} : vector<1x64xf32> to vector<1x32xf32>
    %46 = arith.mulf %44, %44 : vector<1x32xf32>
    %47 = arith.subf %45, %46 : vector<1x32xf32>
    %cst_19 = arith.constant 0.000000e+00 : f32
    %48 = vector.broadcast %cst_19 : f32 to vector<1x32xf32>
    %49 = arith.maximumf %47, %48 : vector<1x32xf32>
    %50 = vector.extract_strided_slice %37 {offsets = [0, 0], sizes = [1, 32], strides = [1, 1]} : vector<2x32xf32> to vector<1x32xf32>
    %cst_20 = arith.constant 9.99999974E-6 : f32
    %51 = vector.broadcast %cst_20 : f32 to vector<1x32xf32>
    %52 = arith.addf %49, %51 : vector<1x32xf32>
    %53 = math.rsqrt %52 : vector<1x32xf32>
    %54 = arith.mulf %50, %53 : vector<1x32xf32>
    %55 = vector.extract_strided_slice %37 {offsets = [1, 0], sizes = [1, 32], strides = [1, 1]} : vector<2x32xf32> to vector<1x32xf32>
    %56 = arith.mulf %44, %54 : vector<1x32xf32>
    %57 = arith.subf %55, %56 : vector<1x32xf32>
    %58 = vector.broadcast %54 : vector<1x32xf32> to vector<8x32xf32>
    %59 = arith.mulf %35, %58 : vector<8x32xf32>
    %60 = vector.broadcast %57 : vector<1x32xf32> to vector<8x32xf32>
    %61 = arith.addf %59, %60 : vector<8x32xf32>
    %cst_21 = arith.constant 0.000000e+00 : f32
    %62 = vector.broadcast %cst_21 : f32 to vector<8x32xf32>
    %63 = arith.maximumf %61, %62 : vector<8x32xf32>
    %64 = arith.truncf %63 : vector<8x32xf32> to vector<8x32xbf16>
    %c1_22 = arith.constant 1 : index
    %c0_23 = arith.constant 0 : index
    %c0_24 = arith.constant 0 : index
    %65 = vector.load %arg2[%c1_22, %c0_23, %c0_24] : memref<2x32x32xbf16, #tpu.memory_space<vmem>>, vector<1x32x32xbf16>
    %66 = vector.shape_cast %65 : vector<1x32x32xbf16> to vector<32x32xbf16>
    %cst_25 = arith.constant dense<0.000000e+00> : vector<8x32xf32>
    %67 = tpu.matmul %64, %66, %cst_25 {dimension_numbers = #tpu.dot_dimension_numbers<[1], [0], [0], [1], [0, 0, 1, 1], [], []>} : vector<8x32xbf16>, vector<32x32xbf16>, vector<8x32xf32> -> vector<8x32xf32>
    %c2 = arith.constant 2 : index
    %c0_26 = arith.constant 0 : index
    %c0_27 = arith.constant 0 : index
    %68 = vector.load %arg3[%c2, %c0_26, %c0_27] : memref<3x2x32xf32, #tpu.memory_space<vmem>>, vector<1x2x32xf32>
    %69 = vector.shape_cast %68 : vector<1x2x32xf32> to vector<2x32xf32>
    %70 = arith.mulf %67, %67 : vector<8x32xf32>
    %71 = tpu.concatenate %67, %70 in 1 : vector<8x32xf32>, vector<8x32xf32> -> vector<8x64xf32>
    %cst_28 = arith.constant dense<0.000000e+00> : vector<64xf32>
    %72 = vector.multi_reduction <add>, %71, %cst_28 [0] : vector<8x64xf32> to vector<64xf32>
    %73 = vector.shape_cast %72 : vector<64xf32> to vector<1x64xf32>
    %cst_29 = arith.constant 1.250000e-01 : f32
    %74 = vector.broadcast %cst_29 : f32 to vector<1x64xf32>
    %75 = arith.mulf %73, %74 : vector<1x64xf32>
    %76 = vector.extract_strided_slice %75 {offsets = [0, 0], sizes = [1, 32], strides = [1, 1]} : vector<1x64xf32> to vector<1x32xf32>
    %77 = vector.extract_strided_slice %75 {offsets = [0, 32], sizes = [1, 32], strides = [1, 1]} : vector<1x64xf32> to vector<1x32xf32>
    %78 = arith.mulf %76, %76 : vector<1x32xf32>
    %79 = arith.subf %77, %78 : vector<1x32xf32>
    %cst_30 = arith.constant 0.000000e+00 : f32
    %80 = vector.broadcast %cst_30 : f32 to vector<1x32xf32>
    %81 = arith.maximumf %79, %80 : vector<1x32xf32>
    %82 = vector.extract_strided_slice %69 {offsets = [0, 0], sizes = [1, 32], strides = [1, 1]} : vector<2x32xf32> to vector<1x32xf32>
    %cst_31 = arith.constant 9.99999974E-6 : f32
    %83 = vector.broadcast %cst_31 : f32 to vector<1x32xf32>
    %84 = arith.addf %81, %83 : vector<1x32xf32>
    %85 = math.rsqrt %84 : vector<1x32xf32>
    %86 = arith.mulf %82, %85 : vector<1x32xf32>
    %87 = vector.extract_strided_slice %69 {offsets = [1, 0], sizes = [1, 32], strides = [1, 1]} : vector<2x32xf32> to vector<1x32xf32>
    %88 = arith.mulf %76, %86 : vector<1x32xf32>
    %89 = arith.subf %87, %88 : vector<1x32xf32>
    %90 = vector.broadcast %86 : vector<1x32xf32> to vector<8x32xf32>
    %91 = arith.mulf %67, %90 : vector<8x32xf32>
    %92 = vector.broadcast %89 : vector<1x32xf32> to vector<8x32xf32>
    %93 = arith.addf %91, %92 : vector<8x32xf32>
    %cst_32 = arith.constant 0.000000e+00 : f32
    %94 = vector.broadcast %cst_32 : f32 to vector<8x32xf32>
    %95 = arith.maximumf %93, %94 : vector<8x32xf32>
    %c0_33 = arith.constant 0 : index
    %c0_34 = arith.constant 0 : index
    %96 = vector.load %arg4[%c0_33, %c0_34] : memref<1x32xf32, #tpu.memory_space<vmem>>, vector<1x32xf32>
    %97 = vector.broadcast %96 : vector<1x32xf32> to vector<8x32xf32>
    %98 = arith.mulf %95, %97 : vector<8x32xf32>
    %cst_35 = arith.constant dense<0.000000e+00> : vector<8xf32>
    %99 = vector.multi_reduction <add>, %98, %cst_35 [1] : vector<8x32xf32> to vector<8xf32>
    %100 = vector.shape_cast %99 : vector<8xf32> to vector<8x1xf32>
    %c0_36 = arith.constant 0 : index
    %101 = memref.load %arg5[%c0_36] : memref<1xf32, #tpu.memory_space<smem>>
    %102 = vector.broadcast %101 : f32 to vector<8x1xf32>
    %103 = arith.addf %100, %102 : vector<8x1xf32>
    %cst_37 = arith.constant 0.000000e+00 : f32
    %104 = vector.broadcast %cst_37 : f32 to vector<8x1xf32>
    %105 = arith.subf %104, %103 : vector<8x1xf32>
    %106 = math.exp %105 : vector<8x1xf32>
    %cst_38 = arith.constant 1.000000e+00 : f32
    %107 = vector.broadcast %cst_38 : f32 to vector<8x1xf32>
    %108 = arith.addf %107, %106 : vector<8x1xf32>
    %109 = tpu.reciprocal %108 {approx = true} : vector<8x1xf32> -> vector<8x1xf32>
    %c0_39 = arith.constant 0 : index
    %c0_40 = arith.constant 0 : index
    %110 = vector.load %arg6[%c0_39, %c0_40] : memref<8x1xf32, #tpu.memory_space<vmem>>, vector<8x1xf32>
    tpu.vector_store %arg6[%c0_39, %c0_40], %109 {strides = array<i32>} : memref<8x1xf32, #tpu.memory_space<vmem>>, vector<8x1xf32>,
    return
  }
}

</mosaic_0001>

<bundles_post_ra>
// kernel: tpu_custom_call.1
= control target key start
LH: loop header
LB: loop body
LE: loop exit
PB: predicated region body
PF: predicated region fallthrough
CT: control target
= control target key end

     0   :  { %12 = vsyncpa [#allocation4], 0  ;;  %s588_s0 = inlined_call_operand.hbm [shape: f32[8,16], index: 0, kind: input, shape index: {}]   ;;  %s589_s1 = inlined_call_operand.hbm [shape: bf16[16,32], index: 1, kind: input, shape index: {}]   ;;  %s590_s2 = inlined_call_operand.hbm [shape: bf16[2,32,32], index: 2, kind: input, shape index: {}]   ;;  %s591_s3 = inlined_call_operand.hbm [shape: f32[3,2,32], index: 3, kind: input, shape index: {}]   ;;  %s592_s4 = inlined_call_operand.vmem [shape: f32[1,32], index: 4, kind: input, shape index: {}]   ;;  %s593_s5 = inlined_call_operand.<no memory space> [shape: f32[1], index: 5, kind: input, shape index: {}]   ;;  %s594_s6 = inlined_call_operand.vmem [shape: f32[8,1], index: 6, kind: output, shape index: {}]  }
   0x1   :  { %13 = vsyncpa [#allocation6], 0  ;;  %s30_s23 = sshll.u32 %s589_s1, 4  ;;  %s31_s23 = int_to_ptr.hbm [resolvable:$true] %s30_s23 }
   0x2   :  { %14 = vsyncpa [#allocation9], 0  ;;  %s503_s24 = smov [#allocation5]   ;;  %s20_s28 = sshll.u32 %s588_s0, 4  ;;  %s21_s28 = int_to_ptr.hbm [resolvable:$true] %s20_s28 }
   0x3   :  { %s32_s25 = sshll.u32 %s503_s24, 4  ;;  %s504_s29 = smov 64   ;;  %s33_s25 = int_to_ptr.vmem [resolvable:$true] %s32_s25 }
   0x4   :  { %s505_s30 = smov 4   ;;  %s506_s7 = smov [#allocation3]  }
   0x5   :  { %38 = dma.hbm_to_vmem [thread:$0]  %s31_s23, 128, %s33_s25, [#allocation6], %s504_s29, %s504_s29, %s505_s30  }
   0x6   :  { %s22_s8 = sshll.u32 %s506_s7, 4  ;;  %s43_s11 = sshll.u32 %s590_s2, 4  ;;  %s23_s8 = int_to_ptr.vmem [resolvable:$true] %s22_s8  ;;  %s44_s11 = int_to_ptr.hbm [resolvable:$true] %s43_s11 }
   0x7   :  { %25 = dma.hbm_to_vmem [thread:$0]  %s21_s28, 128, %s23_s8, [#allocation4]  }
   0x8   :  { %s56_s13 = sshll.u32 %s591_s3, 4  ;;  %s507_s14 = smov [#allocation7]   ;;  %s57_s13 = int_to_ptr.hbm [resolvable:$true] %s56_s13 }
   0x9   :  { %s45_s15 = sshll.u32 %s507_s14, 4  ;;  %s508_s0 = smov [#allocation8]   ;;  %s46_s15 = int_to_ptr.vmem [resolvable:$true] %s45_s15 }
   0xa   :  { %51 = dma.hbm_to_vmem [thread:$0]  %s44_s11, 512, %s46_s15, [#allocation6], %s504_s29, %s504_s29, %s505_s30  }
   0xb   :  { %s58_s16 = sshll.u32 %s508_s0, 4  ;;  %s509_s17 = smov 32   ;;  %s59_s16 = int_to_ptr.vmem [resolvable:$true] %s58_s16 }
   0xc   :  { %s510_s18 = smov 2  }
   0xd   :  { %64 = dma.hbm_to_vmem [thread:$0]  %s57_s13, 96, %s59_s16, [#allocation9], %s509_s17, %s509_s17, %s510_s18  }
   0xe   :  { %497 = dma.done.wait [#allocation4], 128  }
   0xf   :  { %498 = vsyncadd [#allocation4], 4294967168 }
  0x10   :  { %499 = dma.done.wait [#allocation6], 640  }
  0x11   :  { %500 = vsyncadd [#allocation6], 4294966656 }
  0x12   :  { %501 = dma.done.wait [#allocation9], 96  }
  0x13   :  { %502 = vsyncadd [#allocation9], 4294967200  ;;  %v376_v0 = vld [vmem:[#allocation5] sm:$0xff]  ;;  %v86_v1 = vld [vmem:[#allocation3] sm:$0xff]  ;;  %vm96_vm0 = vcmask 130048   ;;  %vm119_vm1 = vcmask 261120  }
  0x14   :  { %v87_v2 = vpack.c.bf16 %v86_v1, %v86_v1  ;;  %107 = vmatpush.bf16.msra.mxu0 %v376_v0  ;;  %vm121_vm2 = vcmask 523264   ;;  %s511_s2 = smov 96   ;;  %v378_v28 = vld [vmem:[#allocation7 + $0x8] sm:$0xff]  ;;  %v377_v29 = vld [vmem:[#allocation7] sm:$0xff]  ;;  %vm344_vm12 = vcmask 7168  }
  0x15   :  { %189 = vmatpush.bf16.msra.mxu1 %v378_v28  ;;  %v113_v30 = vld [vmem:[#allocation8] sm:$0x3] }
  0x17   :  { %357 = vmatmul.msk.bf16.vlgmr.msra.gmra.mxu0 %vm96_vm0, %v87_v2 }
  0x19   :  { %190 = vmatpush.bf16.msra.mxu1 %v377_v29 }
  0x94   :  { %v109_v3 = vpop.f32.mrf.mxu0 }
  0x95   :  { %v114_v4 = vmul.f32 %v109_v3, %v109_v3 }
  0x97   :  { %116 = vrot.lane.b32.xlu0 %v114_v4, %s509_s17  ;;  %v379_v4 = vld [vmem:[#allocation7 + $0x10] sm:$0xff] }
  0x9c   :  { %v111_v5 = vpop.f32.mrf.mxu0 }
  0x9d   :  { %v197_v5 = vld [vmem:[#allocation8 + $0x2] sm:$0x3] }
 0x109   :  { %v117_v6 = vpop.permute.xlu0 %116 }
 0x10a   :  { %v120_v7 = vsel %vm119_vm1, %v109_v3, %v117_v6 }
 0x10b   :  { %v122_v8 = vsel %vm121_vm2, %v120_v7, 0.0 }
 0x10c   :  { %v123_v9 = vrot.slane %v122_v8, 4 }
 0x10e   :  { %v124_v10 = vadd.f32 %v123_v9, %v122_v8 }
 0x110   :  { %v125_v11 = vrot.slane %v124_v10, 2 }
 0x112   :  { %v126_v12 = vadd.f32 %v125_v11, %v124_v10 }
 0x114   :  { %v127_v13 = vrot.slane %v126_v12, 1 }
 0x116   :  { %v128_v14 = vadd.f32 %v127_v13, %v126_v12 }
 0x118   :  { %v129_v15 = vmul.f32 0.125, %v128_v14 }
 0x11a   :  { %v130_v16 = vmul.f32 %v129_v15, %v129_v15 }
 0x11c   :  { %132 = vrot.lane.b32.xlu0 %v130_v16, %s509_s17 }
 0x18e   :  { %v133_v17 = vpop.permute.xlu0 %132 }
 0x18f   :  { %v135_v18 = vsub.f32 %v129_v15, %v133_v17 }
 0x191   :  { %v136_v19 = vmax.f32 %v135_v18, 0.0 }
 0x193   :  { %v137_v20 = vadd.f32 1e-05, %v136_v19 }
 0x195   :  { %391 = vrsqrt.f32 %v137_v20  ;;  %vm144_vm4 = vweird.f32 %v137_v20 }
 0x19b   :  { %v392_v21 = vpop.eup %391 }
 0x19c   :  { %v139_v22 = vmul.f32 %v392_v21, %v137_v20  ;;  %vm145_vm3 = vweird.f32 %v392_v21 }
 0x19d   :  { %vm146_vm5 = vmor %vm144_vm4, %vm145_vm3 }
 0x19e   :  { %v140_v23 = vmul.f32 %v392_v21, %v139_v22 }
 0x1a0   :  { %v141_v24 = vmul.f32 0.5, %v140_v23 }
 0x1a2   :  { %v142_v25 = vsub.f32 1.5, %v141_v24 }
 0x1a4   :  { %v143_v26 = vmul.f32 %v392_v21, %v142_v25 }
 0x1a6   :  { %v147_v27 = vsel %vm146_vm5, %v392_v21, %v143_v26 }
 0x1a7   :  { %149 = vrot.lane.b32.xlu1 %v147_v27, %s511_s2 }
 0x219   :  { %v150_v31 = vpop.permute.xlu1 %149 }
 0x21a   :  { %v152_v32 = vmul.f32 %v150_v31, %v113_v30 }
 0x21c   :  { %v153_v33 = vmul.f32 %v152_v32, %v129_v15  ;;  %v158_v35 = vperm.slane %v152_v32, 0 }
 0x21e   :  { %v155_v34 = vrot.slane %v153_v33, 7  ;;  %v159_v37 = vmul.f32 %v158_v35, %v109_v3  ;;  %v380_v3 = vld [vmem:[#allocation7 + $0x18] sm:$0xff] }
 0x21f   :  { %272 = vmatpush.bf16.msra.mxu2 %v380_v3 }
 0x220   :  { %v157_v36 = vsub.f32 %v113_v30, %v155_v34 }
 0x222   :  { %v160_v38 = vperm.slane %v157_v36, 1 }
 0x223   :  { %273 = vmatpush.bf16.msra.mxu2 %v379_v4 }
 0x224   :  { %v161_v39 = vadd.f32 %v160_v38, %v159_v37 }
 0x226   :  { %v162_v40 = vmax.f32 %v161_v39, 0.0 }
 0x228   :  { %v163_v41 = vpack.c.bf16 %v162_v40, %v162_v40 }
 0x22a   :  { %366 = vmatmul.msk.bf16.vlgmr.msra.gmra.mxu1 %vm119_vm1, %v163_v41 }
 0x2a7   :  { %v192_v42 = vpop.f32.mrf.mxu1 }
 0x2a8   :  { %v198_v43 = vmul.f32 %v192_v42, %v192_v42 }
 0x2aa   :  { %200 = vrot.lane.b32.xlu1 %v198_v43, %s509_s17 }
 0x2af   :  { %v194_v44 = vpop.f32.mrf.mxu1 }
 0x31c   :  { %v201_v45 = vpop.permute.xlu1 %200 }
 0x31d   :  { %v203_v46 = vsel %vm119_vm1, %v192_v42, %v201_v45 }
 0x31e   :  { %v204_v47 = vsel %vm121_vm2, %v203_v46, 0.0 }
 0x31f   :  { %v205_v48 = vrot.slane %v204_v47, 4 }
 0x321   :  { %v206_v49 = vadd.f32 %v205_v48, %v204_v47 }
 0x323   :  { %v207_v50 = vrot.slane %v206_v49, 2 }
 0x325   :  { %v208_v51 = vadd.f32 %v207_v50, %v206_v49 }
 0x327   :  { %v209_v52 = vrot.slane %v208_v51, 1 }
 0x329   :  { %v210_v53 = vadd.f32 %v209_v52, %v208_v51  ;;  %v390_v52 = vld [vmem:[%s592_s4] ss:$0 sm:$0xff] }
 0x32b   :  { %v211_v54 = vmul.f32 0.125, %v210_v53 }
 0x32d   :  { %v212_v55 = vmul.f32 %v211_v54, %v211_v54 }
 0x32f   :  { %214 = vrot.lane.b32.xlu2 %v212_v55, %s509_s17 }
 0x389   :  { %v215_v56 = vpop.permute.xlu2 %214 }
 0x38a   :  { %v217_v57 = vsub.f32 %v211_v54, %v215_v56  ;;  %v337_v56 = vstv %s593_s5 }
 0x38c   :  { %v218_v58 = vmax.f32 %v217_v57, 0.0 }
 0x38e   :  { %v219_v59 = vadd.f32 1e-05, %v218_v58 }
 0x390   :  { %393 = vrsqrt.f32 %v219_v59  ;;  %vm226_vm7 = vweird.f32 %v219_v59 }
 0x396   :  { %v394_v60 = vpop.eup %393 }
 0x397   :  { %v221_v61 = vmul.f32 %v394_v60, %v219_v59  ;;  %vm227_vm6 = vweird.f32 %v394_v60 }
 0x398   :  { %vm228_vm8 = vmor %vm226_vm7, %vm227_vm6 }
 0x399   :  { %v222_v62 = vmul.f32 %v394_v60, %v221_v61 }
 0x39b   :  { %v223_v63 = vmul.f32 0.5, %v222_v62 }
 0x39d   :  { %v224_v0 = vsub.f32 1.5, %v223_v63 }
 0x39f   :  { %v225_v1 = vmul.f32 %v394_v60, %v224_v0 }
 0x3a1   :  { %v229_v2 = vsel %vm228_vm8, %v394_v60, %v225_v1 }
 0x3a2   :  { %231 = vrot.lane.b32.xlu2 %v229_v2, %s511_s2 }
 0x3fc   :  { %v232_v6 = vpop.permute.xlu2 %231 }
 0x3fd   :  { %v234_v7 = vmul.f32 %v232_v6, %v197_v5 }
 0x3ff   :  { %v235_v8 = vmul.f32 %v234_v7, %v211_v54  ;;  %v240_v10 = vperm.slane %v234_v7, 0 }
 0x401   :  { %v237_v9 = vrot.slane %v235_v8, 7  ;;  %v241_v12 = vmul.f32 %v240_v10, %v192_v42  ;;  %v280_v42 = vld [vmem:[#allocation8 + $0x4] sm:$0x3] }
 0x403   :  { %v239_v11 = vsub.f32 %v197_v5, %v237_v9 }
 0x405   :  { %v242_v13 = vperm.slane %v239_v11, 1 }
 0x407   :  { %v243_v14 = vadd.f32 %v242_v13, %v241_v12 }
 0x409   :  { %v244_v15 = vmax.f32 %v243_v14, 0.0 }
 0x40b   :  { %v245_v16 = vpack.c.bf16 %v244_v15, %v244_v15 }
 0x40d   :  { %375 = vmatmul.msk.bf16.vlgmr.msra.gmra.mxu2 %vm119_vm1, %v245_v16 }
 0x490   :  { %v275_v17 = vpop.f32.mrf.mxu2 }
 0x491   :  { %v281_v18 = vmul.f32 %v275_v17, %v275_v17 }
 0x493   :  { %283 = vrot.lane.b32.xlu0 %v281_v18, %s509_s17 }
 0x498   :  { %v277_v19 = vpop.f32.mrf.mxu2 }
 0x505   :  { %v284_v20 = vpop.permute.xlu0 %283 }
 0x506   :  { %v286_v21 = vsel %vm119_vm1, %v275_v17, %v284_v20 }
 0x507   :  { %v287_v22 = vsel %vm121_vm2, %v286_v21, 0.0 }
 0x508   :  { %v288_v23 = vrot.slane %v287_v22, 4 }
 0x50a   :  { %v289_v24 = vadd.f32 %v288_v23, %v287_v22 }
 0x50c   :  { %v290_v25 = vrot.slane %v289_v24, 2 }
 0x50e   :  { %v291_v26 = vadd.f32 %v290_v25, %v289_v24 }
 0x510   :  { %v292_v27 = vrot.slane %v291_v26, 1 }
 0x512   :  { %v293_v28 = vadd.f32 %v292_v27, %v291_v26 }
 0x514   :  { %v294_v29 = vmul.f32 0.125, %v293_v28 }
 0x516   :  { %v295_v30 = vmul.f32 %v294_v29, %v294_v29 }
 0x518   :  { %297 = vrot.lane.b32.xlu1 %v295_v30, %s509_s17 }
 0x58a   :  { %v298_v31 = vpop.permute.xlu1 %297 }
 0x58b   :  { %v300_v32 = vsub.f32 %v294_v29, %v298_v31 }
 0x58d   :  { %v301_v33 = vmax.f32 %v300_v32, 0.0 }
 0x58f   :  { %v302_v34 = vadd.f32 1e-05, %v301_v33 }
 0x591   :  { %395 = vrsqrt.f32 %v302_v34  ;;  %vm309_vm10 = vweird.f32 %v302_v34 }
 0x597   :  { %v396_v35 = vpop.eup %395 }
 0x598   :  { %v304_v36 = vmul.f32 %v396_v35, %v302_v34  ;;  %vm310_vm9 = vweird.f32 %v396_v35 }
 0x599   :  { %vm311_vm11 = vmor %vm309_vm10, %vm310_vm9 }
 0x59a   :  { %v305_v37 = vmul.f32 %v396_v35, %v304_v36 }
 0x59c   :  { %v306_v38 = vmul.f32 0.5, %v305_v37 }
 0x59e   :  { %v307_v39 = vsub.f32 1.5, %v306_v38 }
 0x5a0   :  { %v308_v40 = vmul.f32 %v396_v35, %v307_v39 }
 0x5a2   :  { %v312_v41 = vsel %vm311_vm11, %v396_v35, %v308_v40 }
 0x5a3   :  { %314 = vrot.lane.b32.xlu2 %v312_v41, %s511_s2 }
 0x5fd   :  { %v315_v43 = vpop.permute.xlu2 %314 }
 0x5fe   :  { %v317_v44 = vmul.f32 %v315_v43, %v280_v42 }
 0x600   :  { %v318_v45 = vmul.f32 %v317_v44, %v294_v29  ;;  %v323_v47 = vperm.slane %v317_v44, 0 }
 0x602   :  { %v320_v46 = vrot.slane %v318_v45, 7  ;;  %v324_v49 = vmul.f32 %v323_v47, %v275_v17 }
 0x604   :  { %v322_v48 = vsub.f32 %v280_v42, %v320_v46 }
 0x606   :  { %v325_v50 = vperm.slane %v322_v48, 1 }
 0x608   :  { %v326_v51 = vadd.f32 %v325_v50, %v324_v49 }
 0x60a   :  { %v327_v53 = vmax.f32 %v326_v51, 0.0 }
 0x60c   :  { %v332_v54 = vmul.f32 %v390_v52, %v327_v53 }
 0x60e   :  { %v333_v55 = vsel %vm119_vm1, %v332_v54, 0.0 }
 0x60f   :  { %334 = vadd.xlane.f32.xlu0 %v333_v55 }
 0x682   :  { %v335_v57 = vpop.xlane.xlu0 %334 }
 0x683   :  { %v338_v58 = vadd.f32 %v337_v56, %v335_v57 }
 0x685   :  { %v339_v59 = vsub.f32 0.0, %v338_v58 }
 0x687   :  { %v340_v60 = vmul.f32 1.442695, %v339_v59 }
 0x689   :  { %397 = vpow2.f32 %v340_v60 }
 0x68f   :  { %v398_v61 = vpop.eup %397 }
 0x690   :  { %v342_v62 = vadd.f32 1.0, %v398_v61 }
 0x692   :  { %399 = vrcp.f32 %v342_v62 }
 0x698   :  { %v400_v63 = vpop.eup %399 }
 0x699   :  { %345 = vst.msk [vmem:[%s594_s6] sm:$0xff] %vm344_vm12, %v400_v63 }
 0x69a   :  { %350 = vsyncpa [#allocation4], 1 }
 0x69b   :  { %351 = vsyncpa [#allocation6], 1 }
 0x69c   :  { %352 = vsyncpa [#allocation9], 1 }

</bundles_post_ra>
